<compile_context>
chip_gen: v6e
topology: v6e:2x2x1
jax: 0.10.0
libtpu: 0.0.40
codegen_flags: <defaults>
</compile_context>

<pallas_src>
import functools

import jax
import jax.numpy as jnp
from jax import lax
from jax.experimental import pallas as pl
from jax.experimental.pallas import tpu as pltpu

# Tile preferences. f32: f tile 256x512 (0.5 MiB), c tile 512x512 (1 MiB),
# out/acc 256x512 (0.5 MiB each); with double buffering ~5 MiB total, well
# under the 32 MiB scoped-VMEM default on every generation including v7x.
_TM = 256    # batch tile      (sublane axis, multiple of 8)
_TN = 512    # centers tile    (lane axis, multiple of 128 -> lane-dense stores)
_TK = 512    # feat_dim tile   (lane axis of both operands)

_VMEM_LIMIT = 32 * 1024 * 1024


def _round_up(x, m):
    return ((x + m - 1) // m) * m


def _tile_rows(n):
    """Batch axis: (tile, padded_n)."""
    if n <= _TM:
        t = _round_up(max(n, 8), 8)
        return t, t
    return _TM, _round_up(n, _TM)


def _tile_cols(n):
    """Centers axis: lane-aligned output tiles."""
    if n <= _TN:
        t = _round_up(max(n, 128), 128)
        return t, t
    return _TN, _round_up(n, _TN)


def _tile_k(n):
    """Feature axis: full-dim block when small (no 64x over-padding for D=2)."""
    if n <= _TK:
        return n, n
    return _TK, _round_up(n, _TK)


def _pad2d(x, rows, cols):
    pr, pc = rows - x.shape[0], cols - x.shape[1]
    if pr == 0 and pc == 0:
        return x
    return jnp.pad(x, ((0, pr), (0, pc)))


# ---------------------------------------------------------------------------
# Kernels
# ---------------------------------------------------------------------------

def _l2_kernel(f_ref, c_ref, f2_ref, c2_ref, o_ref, acc_ref, *, inv_d):
    """dist[i,j] = (|f_i|^2 - 2 f_i.c_j + |c_j|^2) * inv_d, K-tiled."""
    k = pl.program_id(2)

    @pl.when(k == 0)
    def _():
        acc_ref[...] = jnp.zeros_like(acc_ref)

    # Contract the last (lane) dim of both operands: MXU consumes the centers
    # tile directly, no c.T / XLU transpose. (If inputs arrive in bf16, feed
    # them uncast here for full MXU throughput; accumulation stays f32.)
    acc_ref[...] += lax.dot_general(
        f_ref[...], c_ref[...],
        dimension_numbers=(((1,), (1,)), ((), ())),
        preferred_element_type=jnp.float32)

    @pl.when(k == pl.num_programs(2) - 1)
    def _():
        # ||f||^2 (TM,1) and ||c||^2 (1,TN) are precomputed outside the hot
        # loop; fold the 1/feat_dim scale into the single epilogue store.
        o_ref[...] = (f2_ref[...] - 2.0 * acc_ref[...] + c2_ref[...]) * inv_d


def _dot_kernel(f_ref, c_ref, o_ref, acc_ref):
    """metric != 'l2' path: plain features @ centers.T (unnormalized)."""
    k = pl.program_id(2)

    @pl.when(k == 0)
    def _():
        acc_ref[...] = jnp.zeros_like(acc_ref)

    acc_ref[...] += lax.dot_general(
        f_ref[...], c_ref[...],
        dimension_numbers=(((1,), (1,)), ((), ())),
        preferred_element_type=jnp.float32)

    @pl.when(k == pl.num_programs(2) - 1)
    def _():
        o_ref[...] = acc_ref[...]


# ---------------------------------------------------------------------------
# pallas_call builders
# ---------------------------------------------------------------------------

def _grid_common(B_pad, C_pad, D_pad, tm, tn, tk):
    grid = (B_pad // tm, C_pad // tn, D_pad // tk)
    compiler_params = pltpu.CompilerParams(
        dimension_semantics=("parallel", "parallel", "arbitrary"),
        vmem_limit_bytes=_VMEM_LIMIT)
    cost = pl.CostEstimate(
        flops=2 * B_pad * C_pad * D_pad,
        transcendentals=0,
        bytes_accessed=4 * (B_pad * D_pad + C_pad * D_pad + B_pad * C_pad
                            + B_pad + C_pad))
    return grid, compiler_params, cost


def _pairwise_l2(f_p, c_p, f2_p, c2_p, tm, tn, tk, inv_d):
    B_pad, D_pad = f_p.shape
    C_pad = c_p.shape[0]
    grid, cparams, cost = _grid_common(B_pad, C_pad, D_pad, tm, tn, tk)
    return pl.pallas_call(
        functools.partial(_l2_kernel, inv_d=inv_d),
        out_shape=jax.ShapeDtypeStruct((B_pad, C_pad), jnp.float32),
        grid_spec=pltpu.PrefetchScalarGridSpec(
            num_scalar_prefetch=0,
            grid=grid,
            in_specs=[
                pl.BlockSpec((tm, tk), lambda i, j, k: (i, k)),   # features
                pl.BlockSpec((tn, tk), lambda i, j, k: (j, k)),   # centers
                pl.BlockSpec((tm, 1), lambda i, j, k: (i, 0)),    # ||f||^2
                pl.BlockSpec((1, tn), lambda i, j, k: (0, j)),    # ||c||^2
            ],
            out_specs=pl.BlockSpec((tm, tn), lambda i, j, k: (i, j)),
            scratch_shapes=[pltpu.VMEM((tm, tn), jnp.float32)],
        ),
        compiler_params=cparams,
        cost_estimate=cost,
    )(f_p, c_p, f2_p, c2_p)


def _pairwise_dot(f_p, c_p, tm, tn, tk):
    B_pad, D_pad = f_p.shape
    C_pad = c_p.shape[0]
    grid, cparams, cost = _grid_common(B_pad, C_pad, D_pad, tm, tn, tk)
    return pl.pallas_call(
        _dot_kernel,
        out_shape=jax.ShapeDtypeStruct((B_pad, C_pad), jnp.float32),
        grid_spec=pltpu.PrefetchScalarGridSpec(
            num_scalar_prefetch=0,
            grid=grid,
            in_specs=[
                pl.BlockSpec((tm, tk), lambda i, j, k: (i, k)),
                pl.BlockSpec((tn, tk), lambda i, j, k: (j, k)),
            ],
            out_specs=pl.BlockSpec((tm, tn), lambda i, j, k: (i, j)),
            scratch_shapes=[pltpu.VMEM((tm, tn), jnp.float32)],
        ),
        compiler_params=cparams,
        cost_estimate=cost,
    )(f_p, c_p)


# ---------------------------------------------------------------------------
# Forward wrapper + module
# ---------------------------------------------------------------------------

def _prep_centers(center):
    """Pad centers + precompute ||c||^2 (hoisted out of the per-call path)."""
    center = center.astype(jnp.float32)
    C, D = center.shape
    _, C_pad = _tile_cols(C)
    _, D_pad = _tile_k(D)
    c_p = _pad2d(center, C_pad, D_pad)
    c2_p = _pad2d(jnp.sum(center * center, axis=1)[None, :], 1, C_pad)
    return c_p, c2_p


@functools.partial(jax.jit, static_argnames=("num_classes", "num_centers", "metric"))
def _dist_forward(features, c_p, c2_p, *, num_classes, num_centers, metric):
    B, D = features.shape
    C = num_classes * num_centers
    C_pad, D_pad = c_p.shape

    tm, B_pad = _tile_rows(B)
    tn = C_pad if C_pad <= _TN else _TN
    tk = D_pad if D_pad <= _TK else _TK

    f32 = features.astype(jnp.float32)
    f_p = _pad2d(f32, B_pad, D_pad)

    if metric == "l2":
        f2_p = _pad2d(jnp.sum(f32 * f32, axis=1, keepdims=True), B_pad, 1)
        dist_p = _pairwise_l2(f_p, c_p, f2_p, c2_p, tm, tn, tk, 1.0 / float(D))
    else:
        dist_p = _pairwise_dot(f_p, c_p, tm, tn, tk)

    dist = dist_p[:B, :C]
    # Cheap glue (identity when num_centers == 1).
    # TODO(synk): for large num_centers, fuse this mean into the kernel
    # epilogue so the full (B, C) matrix never round-trips through HBM.
    dist = dist.reshape(-1, num_classes, num_centers)
    return jnp.mean(dist, axis=2)


class Dist:
    """JAX/Pallas port of RPLoss.Dist (forward pass)."""

    def __init__(self, num_classes=10, num_centers=1, feat_dim=2,
                 init="random5", key=None):
        self.feat_dim = feat_dim
        self.num_classes = num_classes
        self.num_centers = num_centers
        C = num_classes * num_centers
        if init == "random5":
            if key is None:
                key = jax.random.PRNGKey(0)
            self.centers = 0.1 * jax.random.normal(
                key, (C, feat_dim), dtype=jnp.float32)
        else:
            self.centers = jnp.zeros((C, feat_dim), dtype=jnp.float32)
        # Hoist the padding / ||c||^2 precompute out of the per-call path.
        self._c_p, self._c2_p = _prep_centers(self.centers)

    def __call__(self, features, center=None, metric="l2"):
        if center is None:
            c_p, c2_p = self._c_p, self._c2_p
        else:
            c_p, c2_p = _prep_centers(center)
        return _dist_forward(features, c_p, c2_p,
                             num_classes=self.num_classes,
                             num_centers=self.num_centers,
                             metric=metric)


# ---------------------------------------------------------------------------
# Reference + test
# ---------------------------------------------------------------------------

def _reference_l2(features, centers, num_classes, num_centers):
    f2 = jnp.sum(features ** 2, axis=1, keepdims=True)
    c2 = jnp.sum(centers ** 2, axis=1, keepdims=True)
    fc = jnp.matmul(features, centers.T, precision=jax.lax.Precision.HIGHEST)
    dist = (f2 - 2.0 * fc + c2.T) / float(features.shape[1])
    return jnp.mean(dist.reshape(-1, num_classes, num_centers), axis=2)


def _reference_dot(features, centers, num_classes, num_centers):
    fc = jnp.matmul(features, centers.T, precision=jax.lax.Precision.HIGHEST)
    return jnp.mean(fc.reshape(-1, num_classes, num_centers), axis=2)


if __name__ == "__main__":
    key = jax.random.PRNGKey(0)
    k_feat, k_cent, k_feat2, k_cent2 = jax.random.split(key, 4)

    # --- small shape matching the module defaults (single-tile grid) ---
    num_classes, num_centers, feat_dim, batch = 10, 1, 2, 8
    model = Dist(num_classes=num_classes, num_centers=num_centers,
                 feat_dim=feat_dim, init="random5", key=k_cent)
    features = jax.random.normal(k_feat, (batch, feat_dim), dtype=jnp.float32)

    out = jax.block_until_ready(model(features, metric="l2"))
    ref = _reference_l2(features, model.centers, num_classes, num_centers)
    assert out.shape == (batch, num_classes)
    assert jnp.allclose(out, ref, atol=1e-5, rtol=1e-5), "l2 mismatch (small)"

    out_dot = jax.block_until_ready(model(features, metric="dot"))
    ref_dot = _reference_dot(features, model.centers, num_classes, num_centers)
    assert jnp.allclose(out_dot, ref_dot, atol=1e-5, rtol=1e-5), "dot mismatch"

    # --- larger shape exercising the multi-tile grid + K accumulator path ---
    nc2, nk2, fd2, b2 = 10, 3, 600, 272
    model2 = Dist(num_classes=nc2, num_centers=nk2, feat_dim=fd2,
                  init="random5", key=k_cent2)
    feats2 = jax.random.normal(k_feat2, (b2, fd2), dtype=jnp.float32)

    out2 = jax.block_until_ready(model2(feats2, metric="l2"))
    ref2 = _reference_l2(feats2, model2.centers, nc2, nk2)
    assert out2.shape == (b2, nc2)
    assert jnp.allclose(out2, ref2, atol=1e-4, rtol=1e-4), "l2 mismatch (tiled)"

    print("KERNEL_OK")
</pallas_src>

<mosaic_0001>
module attributes {stable_mosaic.version = 11 : i64} {
  func.func @_l2_kernel(%arg0: i32, %arg1: i32, %arg2: i32, %arg3: memref<8x2xf32, #tpu.memory_space<vmem>>, %arg4: memref<128x2xf32, #tpu.memory_space<vmem>>, %arg5: memref<8x1xf32, #tpu.memory_space<vmem>>, %arg6: memref<1x128xf32, #tpu.memory_space<vmem>>, %arg7: memref<8x128xf32, #tpu.memory_space<vmem>>, %arg8: memref<8x128xf32, #tpu.memory_space<vmem>>) attributes {dimension_semantics = [#tpu.dimension_semantics<parallel>, #tpu.dimension_semantics<parallel>, #tpu.dimension_semantics<arbitrary>], iteration_bounds = array<i64: 1, 1, 1>, scalar_prefetch = 0 : i64, scratch_operands = 1 : i64, tpu.core_type = #tpu.core_type<tc>, window_params = [{transform_indices = @transform_0, window_bounds = array<i64: 8, 2>}, {transform_indices = @transform_1, window_bounds = array<i64: 128, 2>}, {transform_indices = @transform_2, window_bounds = array<i64: 8, 1>}, {transform_indices = @transform_3, window_bounds = array<i64: 1, 128>}, {transform_indices = @transform_4, window_bounds = array<i64: 8, 128>}]} {
    %c0_i32 = arith.constant 0 : i32
    %0 = arith.cmpi eq, %arg2, %c0_i32 : i32
    %1 = arith.extui %0 : i1 to i32
    %c0_i32_0 = arith.constant 0 : i32
    %2 = arith.cmpi ne, %1, %c0_i32_0 : i32
    scf.if %2 {
      %cst_10 = arith.constant 0.000000e+00 : f32
      %12 = vector.broadcast %cst_10 : f32 to vector<8x128xf32>
      %c0_11 = arith.constant 0 : index
      %c0_12 = arith.constant 0 : index
      %13 = vector.load %arg8[%c0_11, %c0_12] : memref<8x128xf32, #tpu.memory_space<vmem>>, vector<8x128xf32>
      tpu.vector_store %arg8[%c0_11, %c0_12], %12 {strides = array<i32>} : memref<8x128xf32, #tpu.memory_space<vmem>>, vector<8x128xf32>,
    } else {
    }
    %c0 = arith.constant 0 : index
    %c0_1 = arith.constant 0 : index
    %3 = vector.load %arg8[%c0, %c0_1] : memref<8x128xf32, #tpu.memory_space<vmem>>, vector<8x128xf32>
    %c0_2 = arith.constant 0 : index
    %c0_3 = arith.constant 0 : index
    %4 = vector.load %arg3[%c0_2, %c0_3] : memref<8x2xf32, #tpu.memory_space<vmem>>, vector<8x2xf32>
    %c0_4 = arith.constant 0 : index
    %c0_5 = arith.constant 0 : index
    %5 = vector.load %arg4[%c0_4, %c0_5] : memref<128x2xf32, #tpu.memory_space<vmem>>, vector<128x2xf32>
    %cst = arith.constant dense<0.000000e+00> : vector<8x128xf32>
    %6 = tpu.matmul %4, %5, %cst {dimension_numbers = #tpu.dot_dimension_numbers<[1], [1], [0], [0], [0, 0, 1, 0], [], []>} : vector<8x2xf32>, vector<128x2xf32>, vector<8x128xf32> -> vector<8x128xf32>
    %7 = arith.addf %3, %6 : vector<8x128xf32>
    %c0_6 = arith.constant 0 : index
    %c0_7 = arith.constant 0 : index
    %8 = vector.load %arg8[%c0_6, %c0_7] : memref<8x128xf32, #tpu.memory_space<vmem>>, vector<8x128xf32>
    tpu.vector_store %arg8[%c0_6, %c0_7], %7 {strides = array<i32>} : memref<8x128xf32, #tpu.memory_space<vmem>>, vector<8x128xf32>,
    %c0_i32_8 = arith.constant 0 : i32
    %9 = arith.cmpi eq, %arg2, %c0_i32_8 : i32
    %10 = arith.extui %9 : i1 to i32
    %c0_i32_9 = arith.constant 0 : i32
    %11 = arith.cmpi ne, %10, %c0_i32_9 : i32
    scf.if %11 {
      %c0_10 = arith.constant 0 : index
      %c0_11 = arith.constant 0 : index
      %12 = vector.load %arg5[%c0_10, %c0_11] : memref<8x1xf32, #tpu.memory_space<vmem>>, vector<8x1xf32>
      %c0_12 = arith.constant 0 : index
      %c0_13 = arith.constant 0 : index
      %13 = vector.load %arg8[%c0_12, %c0_13] : memref<8x128xf32, #tpu.memory_space<vmem>>, vector<8x128xf32>
      %cst_14 = arith.constant 2.000000e+00 : f32
      %14 = vector.broadcast %cst_14 : f32 to vector<8x128xf32>
      %15 = arith.mulf %14, %13 : vector<8x128xf32>
      %16 = vector.broadcast %12 : vector<8x1xf32> to vector<8x128xf32>
      %17 = arith.subf %16, %15 : vector<8x128xf32>
      %c0_15 = arith.constant 0 : index
      %c0_16 = arith.constant 0 : index
      %18 = vector.load %arg6[%c0_15, %c0_16] : memref<1x128xf32, #tpu.memory_space<vmem>>, vector<1x128xf32>
      %19 = vector.broadcast %18 : vector<1x128xf32> to vector<8x128xf32>
      %20 = arith.addf %17, %19 : vector<8x128xf32>
      %cst_17 = arith.constant 5.000000e-01 : f32
      %21 = vector.broadcast %cst_17 : f32 to vector<8x128xf32>
      %22 = arith.mulf %20, %21 : vector<8x128xf32>
      %c0_18 = arith.constant 0 : index
      %c0_19 = arith.constant 0 : index
      %23 = vector.load %arg7[%c0_18, %c0_19] : memref<8x128xf32, #tpu.memory_space<vmem>>, vector<8x128xf32>
      tpu.vector_store %arg7[%c0_18, %c0_19], %22 {strides = array<i32>} : memref<8x128xf32, #tpu.memory_space<vmem>>, vector<8x128xf32>,
    } else {
    }
    return
  }
  func.func @transform_0(%arg0: i32, %arg1: i32, %arg2: i32) -> (i32, i32) {
    %c0_i32 = arith.constant 0 : i32
    return %arg0, %arg2 : i32, i32
  }
  func.func @transform_1(%arg0: i32, %arg1: i32, %arg2: i32) -> (i32, i32) {
    %c0_i32 = arith.constant 0 : i32
    return %arg1, %arg2 : i32, i32
  }
  func.func @transform_2(%arg0: i32, %arg1: i32, %arg2: i32) -> (i32, i32) {
    %c0_i32 = arith.constant 0 : i32
    %c0_i32_0 = arith.constant 0 : i32
    return %arg0, %c0_i32 : i32, i32
  }
  func.func @transform_3(%arg0: i32, %arg1: i32, %arg2: i32) -> (i32, i32) {
    %c0_i32 = arith.constant 0 : i32
    %c0_i32_0 = arith.constant 0 : i32
    return %c0_i32, %arg1 : i32, i32
  }
  func.func @transform_4(%arg0: i32, %arg1: i32, %arg2: i32) -> (i32, i32) {
    %c0_i32 = arith.constant 0 : i32
    return %arg0, %arg1 : i32, i32
  }
}

</mosaic_0001>

<bundles_post_ra>
// kernel: _dist_forward.1
= control target key start
LH: loop header
LB: loop body
LE: loop exit
PB: predicated region body
PF: predicated region fallthrough
CT: control target
= control target key end

     0   :  { %vm41_vm0 = vcmask 15360   ;;  %v298_v1 = vmov 0.0   ;;  %vm299_vm1 = vmmov 0   ;;  %v300_v2 = vmov 0   ;;  %s404_s0 = inlined_call_operand.vmem [shape: f32[8,2], index: 0, kind: input, shape index: {}]   ;;  %s405_s1 = inlined_call_operand.vmem [shape: f32[128,2], index: 1, kind: input, shape index: {}]   ;;  %s406_s2 = inlined_call_operand.vmem [shape: f32[8,1], index: 2, kind: input, shape index: {}]   ;;  %s407_s3 = inlined_call_operand.vmem [shape: f32[1,128], index: 3, kind: input, shape index: {}]   ;;  %s408_s4 = inlined_call_operand.hbm [shape: f32[8,128], index: 4, kind: output, shape index: {}]  }
   0x1   :  { %v40_v0 = vld [vmem:[%s405_s1 + $0x78] sm:$0xff]  ;;  %236 = vmatprep.subr.mxu0 %v298_v1  ;;  %268 = vmatprep.mubr.msk.f32.mxu0 %vm299_vm1, %v298_v1  ;;  %v39_v3 = vld [vmem:[%s405_s1 + $0x70] sm:$0xff]  ;;  %v168_v4 = vld [vmem:[%s406_s2] sm:$0xff] }
   0x2   :  { %237 = vmatpush3.xpose.msk.msra.mxu0 %vm41_vm0, %v40_v0  ;;  %275 = vset.pattern.permute.xlu0 %v300_v2 }
   0x3   :  { %238 = vmatprep.subr.mxu0 %v298_v1  ;;  %173 = vperm.xlu0 %275, %v168_v4  }
   0x6   :  { %239 = vmatpush3.xpose.msk.msra.mxu0 %vm41_vm0, %v39_v3 }
   0x7   :  { %9 = vsyncpa [#allocation4], 0  ;;  %240 = vmatprep.subr.mxu0 %v298_v1  ;;  %v38_v5 = vld [vmem:[%s405_s1 + $0x68] sm:$0xff]  ;;  %v37_v6 = vld [vmem:[%s405_s1 + $0x60] sm:$0xff]  ;;  %s301_s25 = smov [#allocation3]  }
   0x8   :  { %v36_v7 = vld [vmem:[%s405_s1 + $0x58] sm:$0xff]  ;;  %v35_v8 = vld [vmem:[%s405_s1 + $0x50] sm:$0xff]  ;;  %v34_v9 = vld [vmem:[%s405_s1 + $0x48] sm:$0xff]  ;;  %s193_s26 = sshll.u32 %s301_s25, 4  ;;  %s194_s26 = int_to_ptr.vmem [resolvable:$true] %s193_s26 }
   0x9   :  { %v33_v10 = vld [vmem:[%s405_s1 + $0x40] sm:$0xff]  ;;  %v32_v11 = vld [vmem:[%s405_s1 + $0x38] sm:$0xff]  ;;  %v31_v12 = vld [vmem:[%s405_s1 + $0x30] sm:$0xff]  ;;  %p281_p1 = scmp.lt.s32.totalorder %s194_s26, %s194_s26 }
   0xa   :  { %241 = vmatpush3.xpose.msk.msra.mxu0 %vm41_vm0, %v38_v5  ;;  %v30_v13 = vld [vmem:[%s405_s1 + $0x28] sm:$0xff]  ;;  %v29_v14 = vld [vmem:[%s405_s1 + $0x20] sm:$0xff]  ;;  %v28_v15 = vld [vmem:[%s405_s1 + $0x18] sm:$0xff] }
   0xb   :  { %242 = vmatprep.subr.mxu0 %v298_v1  ;;  %v27_v16 = vld [vmem:[%s405_s1 + $0x10] sm:$0xff]  ;;  %v26_v17 = vld [vmem:[%s405_s1 + $0x8] sm:$0xff]  ;;  %v25_v18 = vld [vmem:[%s405_s1] sm:$0xff]  ;;  %s276_s1 = scalar_lea.vmem %s194_s26, 128 }
   0xc   :  { %v24_v19 = vld [vmem:[%s404_s0] sm:$0xff]  ;;  %p277_p0 = scmp.ne.s32.totalorder %s194_s26, %s276_s1  ;;  %p282_p2 = scmp.lt.s32.totalorder %s276_s1, %s276_s1 }
   0xd   :  { %v218_v23 = vld [vmem:[%s407_s3] ss:$0 sm:$0xff] }
   0xe   :  { %243 = vmatpush3.xpose.msk.msra.mxu0 %vm41_vm0, %v37_v6  ;;  %p283_p3 = por %p282_p2, %p281_p1 }
   0xf   :  { %244 = vmatprep.subr.mxu0 %v298_v1 }
  0x10   :  { %p284_p4 = pnand %p283_p3, %p277_p0 }
  0x12   :  { %245 = vmatpush3.xpose.msk.msra.mxu0 %vm41_vm0, %v36_v7 }
  0x13   :  { %246 = vmatprep.subr.mxu0 %v298_v1 }
  0x16   :  { %247 = vmatpush3.xpose.msk.msra.mxu0 %vm41_vm0, %v35_v8 }
  0x17   :  { %248 = vmatprep.subr.mxu0 %v298_v1 }
  0x1a   :  { %249 = vmatpush3.xpose.msk.msra.mxu0 %vm41_vm0, %v34_v9 }
  0x1b   :  { %250 = vmatprep.subr.mxu0 %v298_v1 }
  0x1e   :  { %251 = vmatpush3.xpose.msk.msra.mxu0 %vm41_vm0, %v33_v10 }
  0x1f   :  { %252 = vmatprep.subr.mxu0 %v298_v1 }
  0x22   :  { %253 = vmatpush3.xpose.msk.msra.mxu0 %vm41_vm0, %v32_v11 }
  0x23   :  { %254 = vmatprep.subr.mxu0 %v298_v1 }
  0x26   :  { %255 = vmatpush3.xpose.msk.msra.mxu0 %vm41_vm0, %v31_v12 }
  0x27   :  { %256 = vmatprep.subr.mxu0 %v298_v1 }
  0x2a   :  { %257 = vmatpush3.xpose.msk.msra.mxu0 %vm41_vm0, %v30_v13 }
  0x2b   :  { %258 = vmatprep.subr.mxu0 %v298_v1 }
  0x2e   :  { %259 = vmatpush3.xpose.msk.msra.mxu0 %vm41_vm0, %v29_v14 }
  0x2f   :  { %260 = vmatprep.subr.mxu0 %v298_v1 }
  0x32   :  { %261 = vmatpush3.xpose.msk.msra.mxu0 %vm41_vm0, %v28_v15 }
  0x33   :  { %262 = vmatprep.subr.mxu0 %v298_v1 }
  0x36   :  { %263 = vmatpush3.xpose.msk.msra.mxu0 %vm41_vm0, %v27_v16 }
  0x37   :  { %264 = vmatprep.subr.mxu0 %v298_v1 }
  0x3a   :  { %265 = vmatpush3.xpose.msk.msra.mxu0 %vm41_vm0, %v26_v17 }
  0x3b   :  { %266 = vmatprep.subr.mxu0 %v298_v1 }
  0x3e   :  { %267 = vmatpush3.xpose.msk.msra.mxu0 %vm41_vm0, %v25_v18 }
  0x41   :  { %269 = vmatmul.mubr.msk.f32.vlgmr.msra.gmra.mxu0 %vm41_vm0, %v24_v19 }
  0x7e   :  { %v174_v21 = vpop.permute.xlu0 %173 }
 0x101   :  { %v159_v20 = vpop.f32.mrf.mxu0 }
 0x102   :  { %v170_v22 = vmul.f32 2.0, %v159_v20 }
 0x103   :  { %v270_v24 = vpop.f32.mrf.mxu0 }
 0x104   :  { %v176_v25 = vsub.f32 %v174_v21, %v170_v22 }
 0x106   :  { %v184_v26 = vadd.f32 %v218_v23, %v176_v25 }
 0x108   :  { %v185_v27 = vmul.f32 0.5, %v184_v26 }
 0x10a   :  { %186 = vst [vmem:[#allocation3] sm:$0xff] %v185_v27 }
 0x10b   :  { %287 = shalt.err (!%p284_p4)
}
 0x10c   :  { %196 = dma.vmem_to_hbm [thread:$0]  %s194_s26, 128, %s408_s4, [#allocation4]  }
 0x10d   :  { %296 = dma.done.wait [#allocation4], 128  }
 0x10e   :  { %297 = vsyncadd [#allocation4], 4294967168 }
 0x10f   :  { %200 = vsyncpa [#allocation4], 1 }

</bundles_post_ra>
